<compile_context>
chip_gen: v5e
topology: v5e:2x2
jax: 0.10.0
libtpu: 0.0.40
codegen_flags: <defaults>
</compile_context>

<pallas_src>
import jax
import jax.numpy as jnp
from jax.experimental import pallas as pl
from jax.experimental.pallas import tpu as pltpu

BN_EPS = 1e-5


def _round_up(v, m):
    return ((v + m - 1) // m) * m


def _conv_relu(p_ref, w_ref):
    # (OC_pad, Kb) bf16 x (Kb, TM) bf16 -> (OC_pad, TM) f32 on the MXU, then ReLU (VPU).
    y = jnp.dot(w_ref[...], p_ref[...], preferred_element_type=jnp.float32)
    return jnp.maximum(y, 0.0)


def conv_relu_stats_kernel(p_ref, w_ref, stats_ref):
    """Sweep 1: conv-as-matmul (bias folded via the ones row), ReLU, per-tile partial
    per-channel sum / sum-of-squares. Zero-padded M columns (incl. the ones row)
    contribute exactly 0 to both sums."""
    y = _conv_relu(p_ref, w_ref)
    stats_ref[:, 0:1] = jnp.sum(y, axis=1, keepdims=True)
    stats_ref[:, 1:2] = jnp.sum(y * y, axis=1, keepdims=True)


def conv_relu_bn_kernel(p_ref, w_ref, scale_ref, shift_ref, o_ref):
    """Sweep 2: recompute conv + ReLU (cheaper than an HBM y round-trip), apply the
    folded BN affine, and store only the OC useful sublane rows (M is lane-dense)."""
    y = _conv_relu(p_ref, w_ref)
    y = y * scale_ref[...] + shift_ref[...]          # (OC_pad, 1) broadcast over lanes
    o_ref[...] = y[: o_ref.shape[0], :].astype(o_ref.dtype)


def _im2col_t(x, kh, kw, stride):
    # x: (N, C, H, W) -> (C*KH*KW, N*OH*OW); K order = (C, KH, KW), M order = (N, OH, OW).
    n, c, h, w = x.shape
    oh = (h - kh) // stride + 1
    ow = (w - kw) // stride + 1
    cols = []
    for i in range(kh):
        for j in range(kw):
            cols.append(x[:, :, i:i + stride * oh:stride, j:j + stride * ow:stride])
    p = jnp.stack(cols, axis=0)            # (KH*KW, N, C, OH, OW)
    p = p.transpose(2, 0, 1, 3, 4)         # (C, KH*KW, N, OH, OW)
    return p.reshape(c * kh * kw, n * oh * ow), oh, ow


def conv_block_forward(x, weight, bias, gamma, beta, *, stride=1, tile_m=2048,
                       eps=BN_EPS):
    """x: (N, C, H, W) f32; weight: (OC, C, KH, KW); bias/gamma/beta: (OC,)."""
    n, c, h, w = x.shape
    oc, _, kh, kw = weight.shape
    patches_t, oh, ow = _im2col_t(x, kh, kw, stride)          # (K, M) f32
    k, m = patches_t.shape

    kb = k + 1                               # ones row for the folded conv bias
    oc_pad = _round_up(oc, 128)              # MXU-friendly; padded channels never reach HBM
    tile_m = max(128, min(_round_up(tile_m, 128), _round_up(m, 128)))
    m_tiles = pl.cdiv(m, tile_m)
    m_pad = m_tiles * tile_m

    # Patches (K+1, M_pad): ones row for the bias fold, zero-pad along M only, bf16 for MXU.
    # TODO(synk): for production conv sizes replace wrapper-side im2col with an in-kernel
    # implicit-GEMM gather (x kept NCHW in HBM via memory_space=pl.ANY) to avoid the
    # KH*KW-fold HBM duplication of the input.
    pT = jnp.concatenate([patches_t, jnp.ones((1, m), patches_t.dtype)], axis=0)
    pT = jnp.pad(pT, ((0, 0), (0, m_pad - m))).astype(jnp.bfloat16)

    # Weights (OC_pad, K+1) with the conv bias folded as an extra column (K unpadded).
    wT = weight.reshape(oc, k)
    wT = jnp.concatenate([wT, bias.reshape(oc, 1)], axis=1)
    wT = jnp.pad(wT, ((0, oc_pad - oc), (0, 0))).astype(jnp.bfloat16)

    parallel = pltpu.CompilerParams(dimension_semantics=("parallel",))

    # ---- Sweep 1: per-tile partial per-channel sum / sumsq (stats only, no y output). ----
    stats = pl.pallas_call(
        conv_relu_stats_kernel,
        out_shape=jax.ShapeDtypeStruct((m_tiles, oc_pad, 2), jnp.float32),
        grid=(m_tiles,),
        in_specs=[
            pl.BlockSpec((kb, tile_m), lambda i: (0, i)),
            pl.BlockSpec((oc_pad, kb), lambda i: (0, 0)),      # resident weights
        ],
        out_specs=pl.BlockSpec((None, oc_pad, 2), lambda i: (i, 0, 0)),
        compiler_params=parallel,
    )(pT, wT)

    # ---- BN batch statistics (training mode, biased variance) over the true M rows. ----
    totals = jnp.sum(stats, axis=0)                           # (OC_pad, 2)
    mean = totals[:, 0] / m
    # TODO(synk): E[y^2]-E[y]^2 in f32 can cancel for large-mean channels; benign post-ReLU here.
    var = jnp.maximum(totals[:, 1] / m - mean * mean, 0.0)
    inv_std = jax.lax.rsqrt(var + eps)
    gamma_pad = jnp.pad(gamma, (0, oc_pad - oc))
    beta_pad = jnp.pad(beta, (0, oc_pad - oc))
    scale = (gamma_pad * inv_std).reshape(oc_pad, 1)
    shift = (beta_pad - mean * gamma_pad * inv_std).reshape(oc_pad, 1)

    # ---- Sweep 2: recompute conv + ReLU, apply folded scale/shift, write (OC, M_pad). ----
    out_t = pl.pallas_call(
        conv_relu_bn_kernel,
        out_shape=jax.ShapeDtypeStruct((oc, m_pad), jnp.float32),
        grid=(m_tiles,),
        in_specs=[
            pl.BlockSpec((kb, tile_m), lambda i: (0, i)),
            pl.BlockSpec((oc_pad, kb), lambda i: (0, 0)),
            pl.BlockSpec((oc_pad, 1), lambda i: (0, 0)),
            pl.BlockSpec((oc_pad, 1), lambda i: (0, 0)),
        ],
        out_specs=pl.BlockSpec((oc, tile_m), lambda i: (0, i)),
        compiler_params=parallel,
    )(pT, wT, scale, shift)

    # (OC, M) -> (N, OC, OH, OW).
    # TODO(synk): BatchNorm2d running_mean/running_var are not updated (forward
    # activation only, training-mode batch statistics).
    return out_t[:, :m].reshape(oc, n, oh, ow).transpose(1, 0, 2, 3)


def _reference_conv_block(x, weight, bias, gamma, beta, *, stride=1, eps=BN_EPS):
    """Pure-JAX f32 reference of Conv2d -> ReLU -> BatchNorm2d (batch statistics)."""
    y = jax.lax.conv_general_dilated(
        x, weight, window_strides=(stride, stride), padding="VALID",
        dimension_numbers=("NCHW", "OIHW", "NCHW"))
    y = y + bias[None, :, None, None]
    y = jnp.maximum(y, 0.0)
    mean = jnp.mean(y, axis=(0, 2, 3), keepdims=True)
    var = jnp.mean((y - mean) ** 2, axis=(0, 2, 3), keepdims=True)
    g = gamma[None, :, None, None]
    b = beta[None, :, None, None]
    return g * (y - mean) * jax.lax.rsqrt(var + eps) + b


if __name__ == "__main__":
    # Small shapes consistent with the module: batch=2, in_channels=4,
    # out_channels=8, spatial=16, kernel_size=3, stride=1.
    N, C_IN, C_OUT, H, W, K = 2, 4, 8, 16, 16, 3

    key = jax.random.PRNGKey(0)
    kx, kw_, kb_, kg_, kbt_ = jax.random.split(key, 5)

    x = jax.random.normal(kx, (N, C_IN, H, W), dtype=jnp.float32)

    # Deterministic parameter init (Conv2d kaiming-uniform-like scale; non-trivial BN affine).
    fan_in = C_IN * K * K
    bound = 1.0 / (fan_in ** 0.5)
    weight = jax.random.uniform(kw_, (C_OUT, C_IN, K, K), jnp.float32, -bound, bound)
    bias = jax.random.uniform(kb_, (C_OUT,), jnp.float32, -bound, bound)
    gamma = jax.random.uniform(kg_, (C_OUT,), jnp.float32, 0.5, 1.5)
    beta = 0.1 * jax.random.normal(kbt_, (C_OUT,), dtype=jnp.float32)

    ref = _reference_conv_block(x, weight, bias, gamma, beta, stride=1)
    expected_shape = (N, C_OUT, H - K + 1, W - K + 1)  # (2, 8, 14, 14)

    # tile_m=128 exercises multiple grid steps (M = 2*14*14 = 392 -> 4 tiles) plus the
    # zero-padded partial last tile; the default tile_m exercises the large single-tile path.
    for tm in (128, 2048):
        out = conv_block_forward(x, weight, bias, gamma, beta, stride=1, tile_m=tm)
        out = jax.block_until_ready(out)
        assert out.shape == expected_shape, (out.shape, expected_shape)
        max_err = float(jnp.max(jnp.abs(out - ref)))
        # bf16 patches/weights feed the MXU -> loose tolerance vs the f32 reference.
        assert max_err < 1e-1, f"tile_m={tm}: max abs err {max_err}"

    print("KERNEL_OK")
</pallas_src>

<mosaic_0001>
module attributes {stable_mosaic.version = 11 : i64} {
  func.func @conv_relu_stats_kernel(%arg0: i32, %arg1: memref<37x128xbf16, #tpu.memory_space<vmem>>, %arg2: memref<128x37xbf16, #tpu.memory_space<vmem>>, %arg3: memref<1x128x2xf32, #tpu.memory_space<vmem>>) attributes {dimension_semantics = [#tpu.dimension_semantics<parallel>], iteration_bounds = array<i64: 4>, scalar_prefetch = 0 : i64, scratch_operands = 0 : i64, tpu.core_type = #tpu.core_type<tc>, window_params = [{transform_indices = @transform_0, window_bounds = array<i64: 37, 128>}, {pipeline_mode = #tpu.pipeline_mode<synchronous>, transform_indices = @transform_1, window_bounds = array<i64: 128, 37>}, {transform_indices = @transform_2, window_bounds = array<i64: 1, 128, 2>}]} {
    %c0 = arith.constant 0 : index
    %c0_0 = arith.constant 0 : index
    %0 = vector.load %arg2[%c0, %c0_0] : memref<128x37xbf16, #tpu.memory_space<vmem>>, vector<128x37xbf16>
    %c0_1 = arith.constant 0 : index
    %c0_2 = arith.constant 0 : index
    %1 = vector.load %arg1[%c0_1, %c0_2] : memref<37x128xbf16, #tpu.memory_space<vmem>>, vector<37x128xbf16>
    %cst = arith.constant dense<0.000000e+00> : vector<128x128xf32>
    %2 = tpu.matmul %0, %1, %cst {dimension_numbers = #tpu.dot_dimension_numbers<[1], [0], [0], [1], [0, 0, 1, 1], [], []>} : vector<128x37xbf16>, vector<37x128xbf16>, vector<128x128xf32> -> vector<128x128xf32>
    %cst_3 = arith.constant 0.000000e+00 : f32
    %3 = vector.broadcast %cst_3 : f32 to vector<128x128xf32>
    %4 = arith.maximumf %2, %3 : vector<128x128xf32>
    %cst_4 = arith.constant dense<0.000000e+00> : vector<128xf32>
    %5 = vector.multi_reduction <add>, %4, %cst_4 [1] : vector<128x128xf32> to vector<128xf32>
    %6 = vector.shape_cast %5 : vector<128xf32> to vector<128x1xf32>
    %c0_5 = arith.constant 0 : index
    %c0_6 = arith.constant 0 : index
    %c0_7 = arith.constant 0 : index
    %7 = vector.load %arg3[%c0_5, %c0_6, %c0_7] : memref<1x128x2xf32, #tpu.memory_space<vmem>>, vector<1x128x1xf32>
    %8 = vector.shape_cast %7 : vector<1x128x1xf32> to vector<128x1xf32>
    %9 = vector.shape_cast %6 : vector<128x1xf32> to vector<1x128x1xf32>
    tpu.vector_store %arg3[%c0_5, %c0_6, %c0_7], %9 {strides = array<i32>} : memref<1x128x2xf32, #tpu.memory_space<vmem>>, vector<1x128x1xf32>,
    %10 = arith.mulf %4, %4 : vector<128x128xf32>
    %cst_8 = arith.constant dense<0.000000e+00> : vector<128xf32>
    %11 = vector.multi_reduction <add>, %10, %cst_8 [1] : vector<128x128xf32> to vector<128xf32>
    %12 = vector.shape_cast %11 : vector<128xf32> to vector<128x1xf32>
    %c0_9 = arith.constant 0 : index
    %c0_10 = arith.constant 0 : index
    %c1 = arith.constant 1 : index
    %13 = vector.load %arg3[%c0_9, %c0_10, %c1] : memref<1x128x2xf32, #tpu.memory_space<vmem>>, vector<1x128x1xf32>
    %14 = vector.shape_cast %13 : vector<1x128x1xf32> to vector<128x1xf32>
    %15 = vector.shape_cast %12 : vector<128x1xf32> to vector<1x128x1xf32>
    tpu.vector_store %arg3[%c0_9, %c0_10, %c1], %15 {strides = array<i32>} : memref<1x128x2xf32, #tpu.memory_space<vmem>>, vector<1x128x1xf32>,
    return
  }
  func.func @transform_0(%arg0: i32) -> (i32, i32) {
    %c0_i32 = arith.constant 0 : i32
    %c0_i32_0 = arith.constant 0 : i32
    return %c0_i32, %arg0 : i32, i32
  }
  func.func @transform_1(%arg0: i32) -> (i32, i32) {
    %c0_i32 = arith.constant 0 : i32
    %c0_i32_0 = arith.constant 0 : i32
    %c0_i32_1 = arith.constant 0 : i32
    return %c0_i32, %c0_i32_0 : i32, i32
  }
  func.func @transform_2(%arg0: i32) -> (i32, i32, i32) {
    %c0_i32 = arith.constant 0 : i32
    %c0_i32_0 = arith.constant 0 : i32
    %c0_i32_1 = arith.constant 0 : i32
    return %arg0, %c0_i32, %c0_i32_0 : i32, i32, i32
  }
}

</mosaic_0001>

<bundles_post_ra>
// kernel: tpu_custom_call.1
= control target key start
LH: loop header
LB: loop body
LE: loop exit
PB: predicated region body
PF: predicated region fallthrough
CT: control target
= control target key end

     0   :  { %s697_s9 = smov 0   ;;  %s699_s10 = smov 0   ;;  %s849_s0 = inlined_call_operand.vmem [shape: bf16[37,512], index: 0, kind: input, shape index: {}]   ;;  %s850_s1 = inlined_call_operand.vmem [shape: bf16[128,37], index: 1, kind: input, shape index: {}]   ;;  %s851_s2 = inlined_call_operand.vmem [shape: f32[4,128,2], index: 2, kind: output, shape index: {}]  }
   0x1   :  { %s701_s11 = smov 0  }
   0x2 LB: > { %s552_s12 = sadd.s32 4294967295, %s679_s11   ;;  %s714_s13 = sadd.s32 1, %s679_s11   ;;  %s679_s11 = sphi %s701_s11, %s854_s11   ;;  %s675_s10 = sphi %s699_s10, %s853_s10   ;;  %s671_s9 = sphi %s697_s9, %s852_s9  }
   0x3   : > { %s16_s14 = ssub.s32 %s679_s11, %s714_s13  ;;  %s19_s15 = sadd.s32 1, %s675_s10 }
   0x4   : > { %p17_p0 = scmp.eq.s32.totalorder %s16_s14, 0  ;;  %p26_p1 = scmp.ne.s32.totalorder %s675_s10, %s671_s9 }
   0x5   : > { %p27_p2 = scmp.eq.s32.totalorder %s679_s11, 0  ;;  %p555_p4 = scmp.ge.s32.totalorder %s679_s11, 4 }
   0x6   : > { %s723_s16 = scalar_select %p17_p0, %s675_s10, %s19_s15  }
   0x7   : > { %p28_p3 = por %p27_p2, %p26_p1  ;;  %102 = sbr.rel (%p555_p4) target bundleno = 21 (0x15), region = 20 }
   0xc   : > { %105 = sbr.rel (!%p28_p3) target bundleno = 21 (0x15), region = 24  ;;  %s107_s17 = sand.u32 (%p28_p3), 1, %s675_s10  }
   0xd   : > { %s556_s18 = sshll.u32 (%p28_p3), %s679_s11, 2  ;;  %s630_s19 = smul.u32 (%p28_p3), 20, %s107_s17 }
   0xe   : > { %s111_s22 = scalar_lea.vmem (%p28_p3), %s849_s0, %s556_s18 }
   0xf   : > { %v128_v0 = vld [vmem:[%s111_s22] sm:$0xf] (%p28_p3)  ;;  %v130_v1 = vld [vmem:[%s111_s22 + $0x10] sm:$0xf] (%p28_p3)  ;;  %s109_s23 = scalar_lea.vmem (%p28_p3), [#allocation2], %s630_s19 }
  0x10   : > { %v132_v2 = vld [vmem:[%s111_s22 + $0x20] sm:$0xf] (%p28_p3)  ;;  %129 = vst [vmem:[%s109_s23] sm:$0xf] (%p28_p3), %v128_v0  ;;  %v134_v3 = vld [vmem:[%s111_s22 + $0x30] sm:$0xf] (%p28_p3) }
  0x11   : > { %131 = vst [vmem:[%s109_s23 + $0x4] sm:$0xf] %v130_v1  ;;  %v136_v4 = vld [vmem:[%s111_s22 + $0x40] sm:$0xf] }
  0x12   : > { %133 = vst [vmem:[%s109_s23 + $0x8] sm:$0xf] %v132_v2 }
  0x13   : > { %135 = vst [vmem:[%s109_s23 + $0xc] sm:$0xf] %v134_v3 }
  0x14   : > { %137 = vst [vmem:[%s109_s23 + $0x10] sm:$0xf] %v136_v4 }
  0x15 PF: > { %p557_p5 = scmp.ge.s32.totalorder %s679_s11, 1  ;;  %p170_p6 = scmp.lt.s32.totalorder %s679_s11, 5 }
  0x17   : > { %p171_p7 = pnand %p557_p5, %p170_p6 }
  0x18   : > { %s177_s24 = sand.u32 (!%p171_p7), 1, %s671_s9   ;;  %p198_p8 = scmp.lt.s32.totalorder (!%p171_p7), %s552_s12, 3 }
  0x19   : > { %174 = sbr.rel (%p171_p7) target bundleno = 375 (0x177), region = 65 }
  0x1a   : > { %s631_s25 = smul.u32 (!%p171_p7), 20, %s177_s24 }
  0x1c   : > { %s179_s26 = scalar_lea.vmem (!%p171_p7), [#allocation2], %s631_s25 }
  0x1e   : > { %vm305_vm0 = vcmask 1041408   ;;  %vm306_vm1 = vcmask 1042432   ;;  %v681_v5 = vmov 65535   ;;  %v224_v7 = vld [vmem:[%s179_s26 + $0x10] sm:$0x7]  ;;  %v620_v12 = vld [vmem:[%s179_s26 + $0x8] sm:$0xff] }
  0x1f   : > { %v307_v6 = vsel %vm305_vm0, 4294967295, %v681_v5  ;;  %v274_v8 = vunpack.c.l.b16 %v224_v7  ;;  %v619_v13 = vld [vmem:[%s179_s26] sm:$0xff]  ;;  %vm280_vm2 = vcmask 302080   ;;  %v612_v18 = vld [vmem:[%s850_s1 + $0x8] sm:$0xff]  ;;  %s856_s12 = smov (!%p198_p8, %s552_s12), 3  ;;  %vm409_vm3 = vcmask 7168  }
  0x20   : > { %v308_v9 = vsel %vm306_vm1, %v307_v6, 0  ;;  %v611_v14 = vld [vmem:[%s850_s1] sm:$0xff]  ;;  %v613_v15 = vld [vmem:[%s850_s1 + $0x10] sm:$0xff]  ;;  %v614_v19 = vld [vmem:[%s850_s1 + $0x18] sm:$0xff]  ;;  %s610_s20 = sshll.u32 %s856_s12, 7  ;;  %vm474_vm4 = vcmask 15368  }
  0x21   : > { %v277_v10 = vpack.c.b16 %v274_v8, %v274_v8  ;;  %v617_v16 = vld [vmem:[%s850_s1 + $0x30] sm:$0xff]  ;;  %v615_v17 = vld [vmem:[%s850_s1 + $0x20] sm:$0xff]  ;;  %v618_v20 = vld [vmem:[%s850_s1 + $0x38] sm:$0xff]  ;;  %s773_s23 = scalar_lea.vmem %s851_s2, %s610_s20 }
  0x22   : > { %v616_v21 = vld [vmem:[%s850_s1 + $0x28] sm:$0xff] }
  0x23   : > { %v310_v11 = vand.u32 %v308_v9, %v277_v10 }
  0x25   : > { %317 = vmatpush.bf16.msra.mxu0 %v310_v11  ;;  %621 = vmatpush.bf16.msra.mxu1 %v310_v11 }
  0x26   : > { %623 = vmatpush.bf16.msra.mxu3 %v310_v11  ;;  %622 = vmatpush.bf16.msra.mxu2 %v310_v11 }
  0x29   : > { %318 = vmatpush.bf16.msra.mxu0 %v620_v12  ;;  %624 = vmatpush.bf16.msra.mxu1 %v620_v12 }
  0x2a   : > { %626 = vmatpush.bf16.msra.mxu3 %v620_v12  ;;  %625 = vmatpush.bf16.msra.mxu2 %v620_v12 }
  0x2d   : > { %319 = vmatpush.bf16.msra.mxu0 %v619_v13  ;;  %627 = vmatpush.bf16.msra.mxu1 %v619_v13 }
  0x2e   : > { %629 = vmatpush.bf16.msra.mxu3 %v619_v13  ;;  %628 = vmatpush.bf16.msra.mxu2 %v619_v13 }
  0x30   : > { %600 = vmatmul.msk.bf16.vlgmr.msra.gmra.mxu0 %vm280_vm2, %v611_v14  ;;  %602 = vmatmul.msk.bf16.vlgmr.msra.gmra.mxu1 %vm280_vm2, %v613_v15 }
  0x31   : > { %606 = vmatmul.msk.bf16.vlgmr.msra.gmra.mxu3 %vm280_vm2, %v617_v16  ;;  %604 = vmatmul.msk.bf16.vlgmr.msra.gmra.mxu2 %vm280_vm2, %v615_v17 }
  0x40   : > { %601 = vmatmul.msk.bf16.gmra.mxu0 %vm280_vm2, %v612_v18  ;;  %603 = vmatmul.msk.bf16.gmra.mxu1 %vm280_vm2, %v614_v19 }
  0x41   : > { %607 = vmatmul.msk.bf16.gmra.mxu3 %vm280_vm2, %v618_v20  ;;  %605 = vmatmul.msk.bf16.gmra.mxu2 %vm280_vm2, %v616_v21 }
  0xad   : > { %v321_v22 = vpop.f32.mrf.mxu0  ;;  %v331_v23 = vpop.f32.mrf.mxu1 }
  0xae   : > { %v361_v24 = vmax.f32 %v321_v22, 0.0  ;;  %v365_v25 = vmax.f32 %v331_v23, 0.0 }
  0xb0   : > { %385 = vadd.xlane.f32.xlu2 %v365_v25  ;;  %377 = vadd.xlane.f32.xlu0 %v361_v24  ;;  %v426_v26 = vmul.f32 %v361_v24, %v361_v24  ;;  %v430_v28 = vmul.f32 %v365_v25, %v365_v25 }
  0xb2   : > { %442 = vadd.xlane.f32.xlu1 %v426_v26 }
  0xb4   : > { %v351_v27 = vpop.f32.mrf.mxu3  ;;  %v341_v31 = vpop.f32.mrf.mxu2 }
  0xb5   : > { %v373_v29 = vmax.f32 %v351_v27, 0.0  ;;  %v323_v32 = vpop.f32.mrf.mxu0  ;;  %v369_v33 = vmax.f32 %v341_v31, 0.0  ;;  %v333_v37 = vpop.f32.mrf.mxu1 }
  0xb6   : > { %v362_v35 = vmax.f32 %v323_v32, 0.0  ;;  %v366_v40 = vmax.f32 %v333_v37, 0.0 }
  0xb7   : > { %v438_v30 = vmul.f32 %v373_v29, %v373_v29  ;;  %v434_v38 = vmul.f32 %v369_v33, %v369_v33 }
  0xb8   : > { %450 = vadd.xlane.f32.xlu2 %v430_v28  ;;  %401 = vadd.xlane.f32.xlu0 %v373_v29  ;;  %v431_v44 = vmul.f32 %v366_v40, %v366_v40  ;;  %v427_v45 = vmul.f32 %v362_v35, %v362_v35 }
  0xba   : > { %466 = vadd.xlane.f32.xlu1 %v438_v30 }
  0xbc   : > { %v353_v34 = vpop.f32.mrf.mxu3  ;;  %v343_v42 = vpop.f32.mrf.mxu2 }
  0xbd   : > { %v374_v36 = vmax.f32 %v353_v34, 0.0  ;;  %v326_v39 = vpop.f32.mrf.mxu0  ;;  %v370_v43 = vmax.f32 %v343_v42, 0.0  ;;  %v336_v47 = vpop.f32.mrf.mxu1 }
  0xbe   : > { %v363_v41 = vmax.f32 %v326_v39, 0.0  ;;  %v367_v49 = vmax.f32 %v336_v47, 0.0 }
  0xbf   : > { %v435_v46 = vmul.f32 %v370_v43, %v370_v43  ;;  %v439_v1 = vmul.f32 %v374_v36, %v374_v36 }
  0xc0   : > { %393 = vadd.xlane.f32.xlu2 %v369_v33  ;;  %379 = vadd.xlane.f32.xlu0 %v362_v35  ;;  %v432_v51 = vmul.f32 %v367_v49, %v367_v49  ;;  %v428_v59 = vmul.f32 %v363_v41, %v363_v41 }
  0xc2   : > { %403 = vadd.xlane.f32.xlu1 %v374_v36 }
  0xc4   : > { %v356_v48 = vpop.f32.mrf.mxu3  ;;  %v346_v52 = vpop.f32.mrf.mxu2 }
  0xc5   : > { %v375_v50 = vmax.f32 %v356_v48, 0.0  ;;  %v371_v53 = vmax.f32 %v346_v52, 0.0  ;;  %v338_v55 = vpop.f32.mrf.mxu1  ;;  %v328_v57 = vpop.f32.mrf.mxu0 }
  0xc6   : > { %v368_v56 = vmax.f32 %v338_v55, 0.0  ;;  %v364_v60 = vmax.f32 %v328_v57, 0.0 }
  0xc7   : > { %v436_v54 = vmul.f32 %v371_v53, %v371_v53  ;;  %v440_v4 = vmul.f32 %v375_v50, %v375_v50 }
  0xc8   : > { %387 = vadd.xlane.f32.xlu2 %v366_v40  ;;  %458 = vadd.xlane.f32.xlu0 %v434_v38  ;;  %v433_v58 = vmul.f32 %v368_v56, %v368_v56  ;;  %v429_v3 = vmul.f32 %v364_v60, %v364_v60 }
  0xca   : > { %381 = vadd.xlane.f32.xlu1 %v363_v41 }
  0xcc   : > { %v348_v61 = vpop.f32.mrf.mxu2  ;;  %v358_v62 = vpop.f32.mrf.mxu3 }
  0xcd   : > { %v372_v63 = vmax.f32 %v348_v61, 0.0  ;;  %v376_v0 = vmax.f32 %v358_v62, 0.0 }
  0xcf   : > { %v437_v2 = vmul.f32 %v372_v63, %v372_v63  ;;  %v441_v5 = vmul.f32 %v376_v0, %v376_v0 }
  0xd0   : > { %452 = vadd.xlane.f32.xlu0 %v431_v44  ;;  %444 = vadd.xlane.f32.xlu2 %v427_v45 }
  0xd2   : > { %460 = vadd.xlane.f32.xlu1 %v435_v46 }
  0xd8   : > { %395 = vadd.xlane.f32.xlu0 %v370_v43  ;;  %405 = vadd.xlane.f32.xlu2 %v375_v50 }
  0xda   : > { %454 = vadd.xlane.f32.xlu1 %v432_v51 }
  0xe0   : > { %389 = vadd.xlane.f32.xlu0 %v367_v49  ;;  %462 = vadd.xlane.f32.xlu2 %v436_v54 }
  0xe2   : > { %397 = vadd.xlane.f32.xlu1 %v371_v53 }
  0xe8   : > { %456 = vadd.xlane.f32.xlu2 %v433_v58  ;;  %446 = vadd.xlane.f32.xlu0 %v428_v59 }
  0xea   : > { %383 = vadd.xlane.f32.xlu1 %v364_v60 }
  0xf0   : > { %399 = vadd.xlane.f32.xlu2 %v372_v63  ;;  %407 = vadd.xlane.f32.xlu0 %v376_v0 }
  0xf2   : > { %391 = vadd.xlane.f32.xlu1 %v368_v56 }
  0xf8   : > { %468 = vadd.xlane.f32.xlu2 %v439_v1  ;;  %464 = vadd.xlane.f32.xlu0 %v437_v2 }
  0xfa   : > { %448 = vadd.xlane.f32.xlu1 %v429_v3 }
 0x100   : > { %470 = vadd.xlane.f32.xlu0 %v440_v4 }
 0x102   : > { %472 = vadd.xlane.f32.xlu1 %v441_v5 }
 0x123   : > { %v386_v6 = vpop.xlane.xlu2 %385  ;;  %v378_v7 = vpop.xlane.xlu0 %377 }
 0x124   : > { %414 = vst.msk [vmem:[%s773_s23 + $0x20] sm:$0xff] %vm409_vm3, %v386_v6 }
 0x125   : > { %410 = vst.msk [vmem:[%s773_s23] sm:$0xff] %vm409_vm3, %v378_v7  ;;  %v443_v8 = vpop.xlane.xlu1 %442 }
 0x126   : > { %475 = vst.msk [vmem:[%s773_s23] sm:$0xff] %vm474_vm4, %v443_v8 }
 0x12b   : > { %v451_v9 = vpop.xlane.xlu2 %450  ;;  %v402_v10 = vpop.xlane.xlu0 %401 }
 0x12c   : > { %479 = vst.msk [vmem:[%s773_s23 + $0x20] sm:$0xff] %vm474_vm4, %v451_v9 }
 0x12d   : > { %422 = vst.msk [vmem:[%s773_s23 + $0x60] sm:$0xff] %vm409_vm3, %v402_v10  ;;  %v467_v11 = vpop.xlane.xlu1 %466 }
 0x12e   : > { %487 = vst.msk [vmem:[%s773_s23 + $0x60] sm:$0xff] %vm474_vm4, %v467_v11 }
 0x133   : > { %v394_v12 = vpop.xlane.xlu2 %393  ;;  %v380_v13 = vpop.xlane.xlu0 %379 }
 0x134   : > { %418 = vst.msk [vmem:[%s773_s23 + $0x40] sm:$0xff] %vm409_vm3, %v394_v12 }
 0x135   : > { %411 = vst.msk [vmem:[%s773_s23 + $0x8] sm:$0xff] %vm409_vm3, %v380_v13  ;;  %v404_v14 = vpop.xlane.xlu1 %403 }
 0x136   : > { %423 = vst.msk [vmem:[%s773_s23 + $0x68] sm:$0xff] %vm409_vm3, %v404_v14 }
 0x13b   : > { %v388_v15 = vpop.xlane.xlu2 %387  ;;  %v459_v16 = vpop.xlane.xlu0 %458 }
 0x13c   : > { %415 = vst.msk [vmem:[%s773_s23 + $0x28] sm:$0xff] %vm409_vm3, %v388_v15 }
 0x13d   : > { %483 = vst.msk [vmem:[%s773_s23 + $0x40] sm:$0xff] %vm474_vm4, %v459_v16  ;;  %v382_v17 = vpop.xlane.xlu1 %381 }
 0x13e   : > { %412 = vst.msk [vmem:[%s773_s23 + $0x10] sm:$0xff] %vm409_vm3, %v382_v17 }
 0x143   : > { %v453_v18 = vpop.xlane.xlu0 %452  ;;  %v445_v19 = vpop.xlane.xlu2 %444 }
 0x144   : > { %480 = vst.msk [vmem:[%s773_s23 + $0x28] sm:$0xff] %vm474_vm4, %v453_v18 }
 0x145   : > { %476 = vst.msk [vmem:[%s773_s23 + $0x8] sm:$0xff] %vm474_vm4, %v445_v19  ;;  %v461_v20 = vpop.xlane.xlu1 %460 }
 0x14b   : > { %v396_v21 = vpop.xlane.xlu0 %395  ;;  %v406_v22 = vpop.xlane.xlu2 %405 }
 0x14c   : > { %419 = vst.msk [vmem:[%s773_s23 + $0x48] sm:$0xff] %vm409_vm3, %v396_v21 }
 0x14d   : > { %484 = vst.msk [vmem:[%s773_s23 + $0x48] sm:$0xff] %vm474_vm4, %v461_v20  ;;  %v455_v23 = vpop.xlane.xlu1 %454 }
 0x14e   : > { %424 = vst.msk [vmem:[%s773_s23 + $0x70] sm:$0xff] %vm409_vm3, %v406_v22 }
 0x153   : > { %v390_v24 = vpop.xlane.xlu0 %389  ;;  %v463_v25 = vpop.xlane.xlu2 %462 }
 0x154   : > { %416 = vst.msk [vmem:[%s773_s23 + $0x30] sm:$0xff] %vm409_vm3, %v390_v24 }
 0x155   : > { %481 = vst.msk [vmem:[%s773_s23 + $0x30] sm:$0xff] %vm474_vm4, %v455_v23  ;;  %v398_v26 = vpop.xlane.xlu1 %397 }
 0x156   : > { %420 = vst.msk [vmem:[%s773_s23 + $0x50] sm:$0xff] %vm409_vm3, %v398_v26 }
 0x157   : > { %485 = vst.msk [vmem:[%s773_s23 + $0x50] sm:$0xff] %vm474_vm4, %v463_v25 }
 0x15b   : > { %v457_v27 = vpop.xlane.xlu2 %456  ;;  %v447_v28 = vpop.xlane.xlu0 %446 }
 0x15c   : > { %477 = vst.msk [vmem:[%s773_s23 + $0x10] sm:$0xff] %vm474_vm4, %v447_v28 }
 0x15d   : > { %v384_v29 = vpop.xlane.xlu1 %383 }
 0x15e   : > { %413 = vst.msk [vmem:[%s773_s23 + $0x18] sm:$0xff] %vm409_vm3, %v384_v29 }
 0x163   : > { %v400_v30 = vpop.xlane.xlu2 %399  ;;  %v408_v31 = vpop.xlane.xlu0 %407 }
 0x164   : > { %421 = vst.msk [vmem:[%s773_s23 + $0x58] sm:$0xff] %vm409_vm3, %v400_v30 }
 0x165   : > { %425 = vst.msk [vmem:[%s773_s23 + $0x78] sm:$0xff] %vm409_vm3, %v408_v31  ;;  %v392_v32 = vpop.xlane.xlu1 %391 }
 0x166   : > { %417 = vst.msk [vmem:[%s773_s23 + $0x38] sm:$0xff] %vm409_vm3, %v392_v32 }
 0x167   : > { %482 = vst.msk [vmem:[%s773_s23 + $0x38] sm:$0xff] %vm474_vm4, %v457_v27 }
 0x16b   : > { %v469_v33 = vpop.xlane.xlu2 %468  ;;  %v465_v34 = vpop.xlane.xlu0 %464 }
 0x16c   : > { %488 = vst.msk [vmem:[%s773_s23 + $0x68] sm:$0xff] %vm474_vm4, %v469_v33 }
 0x16d   : > { %486 = vst.msk [vmem:[%s773_s23 + $0x58] sm:$0xff] %vm474_vm4, %v465_v34  ;;  %v449_v35 = vpop.xlane.xlu1 %448 }
 0x16e   : > { %478 = vst.msk [vmem:[%s773_s23 + $0x18] sm:$0xff] %vm474_vm4, %v449_v35 }
 0x173   : > { %v471_v36 = vpop.xlane.xlu0 %470 }
 0x174   : > { %489 = vst.msk [vmem:[%s773_s23 + $0x70] sm:$0xff] %vm474_vm4, %v471_v36 }
 0x175   : > { %v473_v37 = vpop.xlane.xlu1 %472 }
 0x176   : > { %490 = vst.msk [vmem:[%s773_s23 + $0x78] sm:$0xff] %vm474_vm4, %v473_v37 }
 0x177 PF: > { %p9_p9 = scmp.ge.s32.totalorder %s714_s13, 6   ;;  %s852_s9 = smov %s675_s10 }
 0x178   : > { %s853_s10 = smov %s723_s16  ;;  %s854_s11 = smov %s714_s13 }
 0x179   :  { %11 = sbr.rel (!%p9_p9) target bundleno = 2 (0x2), region = 104 }

</bundles_post_ra>
